<compile_context>
chip_gen: v7x
topology: tpu7x:2x2x1
jax: 0.10.0
libtpu: 0.0.40
codegen_flags: <defaults>
</compile_context>

<pallas_src>
import numpy as np
import jax
import jax.numpy as jnp
from jax.experimental import pallas as pl
from jax.experimental.pallas import tpu as pltpu


def model2_kernel(x_ref, dft_ref, aeo_ref, convb_ref, fcwt_ref, fcb_ref, out_ref):
    F = dft_ref.shape[1] // 2          # rfft bins = L//2 + 1
    H = out_ref.shape[1]               # = L // 2

    # --- |FFT(x)| (norm='forward'), half spectrum: one bf16 MXU dot ---------
    # dft = [cos | -sin] / L, shape (L, 2F); cs = [re | im], shape (TB, 2F).
    cs = jnp.dot(x_ref[...], dft_ref[...], preferred_element_type=jnp.float32)
    re = cs[:, :F]
    im = cs[:, F:]
    spec = jnp.sqrt(re * re + im * im)                      # (TB, F) f32 epilogue

    # --- fused Conv1d(k=5, pad=2) + ReLU + MaxPool1d(2) ----------------------
    # aeo = [Ae' | Ao'] (F, 2H): even/odd output columns of the conv band
    # matrix, with the conjugate-mirror rows already folded in host-side.
    eo = jnp.dot(spec.astype(jnp.bfloat16), aeo_ref[...],
                 preferred_element_type=jnp.float32)        # (TB, 2H)
    # relu(max(a+b, c+b)) == max(relu(a+b), relu(c+b))  (relu monotone, shared b)
    pooled = jnp.maximum(jnp.maximum(eo[:, :H], eo[:, H:]) + convb_ref[...], 0.0)

    # --- Linear + ReLU --------------------------------------------------------
    fc = jnp.dot(pooled.astype(jnp.bfloat16), fcwt_ref[...],
                 preferred_element_type=jnp.float32)
    out_ref[...] = jnp.maximum(fc + fcb_ref[...], 0.0)      # (TB, H) f32


def _build_constants(L, conv_w, conv_b, fc_w, fc_b):
    """Host-side, done once per parameter set (NOT per forward call)."""
    K, pad = 5, 2
    F = L // 2 + 1
    H = L // 2

    # Half-spectrum DFT with norm='forward' (1/L) folded in:
    #   X[k] = (1/L) * sum_n x[n] * exp(-2*pi*i*k*n/L),  k = 0 .. L/2
    n = np.arange(L)
    k = np.arange(F)
    ang = 2.0 * np.pi * np.outer(n, k) / L                        # (L, F)
    dft = np.concatenate([np.cos(ang) / L, -np.sin(ang) / L], axis=1)  # (L, 2F)

    # Banded matrix realizing the zero-padded cross-correlation:
    #   out[m] = sum_j w[j] * x[m + j - pad]  ->  A[n_in, m_out] = w[n_in - m_out + pad]
    w = np.asarray(conv_w, np.float64).reshape(K)
    A = np.zeros((L, L), np.float64)
    for j in range(K):
        A += w[j] * np.eye(L, L, k=pad - j)
    # Fold conjugate symmetry |X[L-k]| == |X[k]| into the rows: k = 1..L/2-1
    # gain their mirror partner; k = 0 and k = L/2 are unmirrored.
    A_half = A[:F].copy()
    A_half[1:L // 2] += A[:L // 2:-1]                              # rows L-1..L/2+1
    # MaxPool1d(2) folded by splitting even/odd output columns; merged RHS.
    aeo = np.concatenate([A_half[:, 0::2], A_half[:, 1::2]], axis=1)   # (F, 2H)

    conv_bias = float(np.asarray(conv_b, np.float64).reshape(-1)[0])
    return (
        jnp.asarray(dft, jnp.bfloat16),                            # (L, 2F)
        jnp.asarray(aeo, jnp.bfloat16),                            # (F, 2H)
        jnp.full((1, H), conv_bias, jnp.float32),                  # bias row
        jnp.asarray(np.asarray(fc_w, np.float32).T, jnp.bfloat16), # (H, H)
        jnp.asarray(np.asarray(fc_b, np.float32).reshape(1, H)),   # (1, H)
    )


def make_model2_forward(conv_w, conv_b, fc_w, fc_b, L, *, batch_tile=128):
    """Build constants once; return a jitted forward(x_bcl) -> (B, L//2)."""
    assert L % 2 == 0
    H = L // 2
    F = L // 2 + 1
    dft, aeo, conv_bias, fc_wt, fc_bias = _build_constants(
        L, np.asarray(conv_w), np.asarray(conv_b),
        np.asarray(fc_w), np.asarray(fc_b))

    @jax.jit
    def forward(x_bcl):
        B, C, Lx = x_bcl.shape
        assert C == 1 and Lx == L
        x2d = x_bcl.reshape(B, L).astype(jnp.bfloat16)

        # Batch grid axis: tiles of TB rows, sharded across TensorCores
        # ("parallel") with weights resident (constant block index).
        tb = B if B <= batch_tile else batch_tile
        grid = (pl.cdiv(B, tb),)

        def const_spec(shape):
            return pl.BlockSpec(shape, lambda b: (0, 0))

        return pl.pallas_call(
            model2_kernel,
            out_shape=jax.ShapeDtypeStruct((B, H), jnp.float32),
            grid=grid,
            in_specs=[
                pl.BlockSpec((tb, L), lambda b: (b, 0)),   # x batch tile
                const_spec((L, 2 * F)),                    # DFT [cos|-sin]/L
                const_spec((F, 2 * H)),                    # [Ae'|Ao']
                const_spec((1, H)),                        # conv bias row
                const_spec((H, H)),                        # fc weight^T
                const_spec((1, H)),                        # fc bias row
            ],
            out_specs=pl.BlockSpec((tb, H), lambda b: (b, 0)),
            compiler_params=pltpu.CompilerParams(
                dimension_semantics=("parallel",)),
        )(x2d, dft, aeo, conv_bias, fc_wt, fc_bias)

    return forward


def reference_numpy(x_bcl, conv_w, conv_b, fc_w, fc_b):
    """Pure numpy reference mirroring the PyTorch forward."""
    x = np.asarray(x_bcl, np.float64)
    B, C, L = x.shape
    spec = np.abs(np.fft.fft(x, axis=2) / L)[:, :, :L]
    xp = np.pad(spec, ((0, 0), (0, 0), (2, 2)))
    w = np.asarray(conv_w, np.float64).reshape(5)
    conv = np.zeros_like(spec)
    for j in range(5):
        conv += w[j] * xp[:, :, j:j + L]
    conv += np.asarray(conv_b, np.float64).reshape(1, 1, 1)
    conv = np.maximum(conv, 0.0)
    pooled = conv.reshape(B, C, L // 2, 2).max(axis=3)
    flat = pooled.reshape(B, -1)
    fc = flat @ np.asarray(fc_w, np.float64).T + np.asarray(fc_b, np.float64)
    return np.maximum(fc, 0.0)


if __name__ == "__main__":
    # Small shapes consistent with the module: InputShape scaled from (2000, 1)
    # down to (L=64, C=1); pooling 2 -> fc dims H = 32.  B = 8 fills one
    # sublane group; for throughput, callers should batch 128-512 rows per
    # call (the kernel supports it unchanged via the batch grid axis).
    B, C, L = 8, 1, 64
    H = L // 2

    key = jax.random.PRNGKey(0)
    k1, k2, k3, k4, kx = jax.random.split(key, 5)

    # Deterministic parameter init (xavier_uniform weights, PyTorch-style biases).
    cw_bound = float(np.sqrt(6.0 / (5 + 5)))
    conv_w = jax.random.uniform(k1, (1, 1, 5), jnp.float32, -cw_bound, cw_bound)
    conv_b = jax.random.uniform(k2, (1,), jnp.float32,
                                -1.0 / np.sqrt(5.0), 1.0 / np.sqrt(5.0))
    fc_bound = float(np.sqrt(6.0 / (H + H)))
    fc_w = jax.random.uniform(k3, (H, H), jnp.float32, -fc_bound, fc_bound)
    fc_b = jax.random.uniform(k4, (H,), jnp.float32,
                              -1.0 / np.sqrt(H), 1.0 / np.sqrt(H))

    x = jax.random.normal(kx, (B, C, L), jnp.float32)

    # Constants built once here; forward is jitted and re-usable.
    forward = make_model2_forward(conv_w, conv_b, fc_w, fc_b, L)
    out = jax.block_until_ready(forward(x))

    ref = reference_numpy(np.asarray(x), np.asarray(conv_w), np.asarray(conv_b),
                          np.asarray(fc_w), np.asarray(fc_b))
    np.testing.assert_allclose(np.asarray(out), ref, rtol=1e-2, atol=1e-2)
    assert out.shape == (B, H) and out.dtype == jnp.float32
    print("KERNEL_OK")
</pallas_src>

<mosaic_0001>
module attributes {stable_mosaic.version = 11 : i64} {
  func.func @model2_kernel(%arg0: i32, %arg1: memref<8x64xbf16, #tpu.memory_space<vmem>>, %arg2: memref<64x66xbf16, #tpu.memory_space<vmem>>, %arg3: memref<33x64xbf16, #tpu.memory_space<vmem>>, %arg4: memref<1x32xf32, #tpu.memory_space<vmem>>, %arg5: memref<32x32xbf16, #tpu.memory_space<vmem>>, %arg6: memref<1x32xf32, #tpu.memory_space<vmem>>, %arg7: memref<8x32xf32, #tpu.memory_space<vmem>>) attributes {dimension_semantics = [#tpu.dimension_semantics<parallel>], iteration_bounds = array<i64: 1>, scalar_prefetch = 0 : i64, scratch_operands = 0 : i64, tpu.core_type = #tpu.core_type<tc>, window_params = [{transform_indices = @transform_0, window_bounds = array<i64: 8, 64>}, {pipeline_mode = #tpu.pipeline_mode<synchronous>, transform_indices = @transform_1, window_bounds = array<i64: 64, 66>}, {pipeline_mode = #tpu.pipeline_mode<synchronous>, transform_indices = @transform_2, window_bounds = array<i64: 33, 64>}, {pipeline_mode = #tpu.pipeline_mode<synchronous>, transform_indices = @transform_3, window_bounds = array<i64: 1, 32>}, {pipeline_mode = #tpu.pipeline_mode<synchronous>, transform_indices = @transform_4, window_bounds = array<i64: 32, 32>}, {pipeline_mode = #tpu.pipeline_mode<synchronous>, transform_indices = @transform_5, window_bounds = array<i64: 1, 32>}, {transform_indices = @transform_6, window_bounds = array<i64: 8, 32>}]} {
    %c0 = arith.constant 0 : index
    %c0_0 = arith.constant 0 : index
    %0 = vector.load %arg1[%c0, %c0_0] : memref<8x64xbf16, #tpu.memory_space<vmem>>, vector<8x64xbf16>
    %c0_1 = arith.constant 0 : index
    %c0_2 = arith.constant 0 : index
    %1 = vector.load %arg2[%c0_1, %c0_2] : memref<64x66xbf16, #tpu.memory_space<vmem>>, vector<64x66xbf16>
    %cst = arith.constant dense<0.000000e+00> : vector<8x66xf32>
    %2 = tpu.matmul %0, %1, %cst {dimension_numbers = #tpu.dot_dimension_numbers<[1], [0], [0], [1], [0, 0, 1, 1], [], []>} : vector<8x64xbf16>, vector<64x66xbf16>, vector<8x66xf32> -> vector<8x66xf32>
    %3 = vector.extract_strided_slice %2 {offsets = [0, 0], sizes = [8, 33], strides = [1, 1]} : vector<8x66xf32> to vector<8x33xf32>
    %4 = vector.extract_strided_slice %2 {offsets = [0, 33], sizes = [8, 33], strides = [1, 1]} : vector<8x66xf32> to vector<8x33xf32>
    %5 = arith.mulf %3, %3 : vector<8x33xf32>
    %6 = arith.mulf %4, %4 : vector<8x33xf32>
    %7 = arith.addf %5, %6 : vector<8x33xf32>
    %8 = math.sqrt %7 : vector<8x33xf32>
    %9 = arith.truncf %8 : vector<8x33xf32> to vector<8x33xbf16>
    %c0_3 = arith.constant 0 : index
    %c0_4 = arith.constant 0 : index
    %10 = vector.load %arg3[%c0_3, %c0_4] : memref<33x64xbf16, #tpu.memory_space<vmem>>, vector<33x64xbf16>
    %cst_5 = arith.constant dense<0.000000e+00> : vector<8x64xf32>
    %11 = tpu.matmul %9, %10, %cst_5 {dimension_numbers = #tpu.dot_dimension_numbers<[1], [0], [0], [1], [0, 0, 1, 1], [], []>} : vector<8x33xbf16>, vector<33x64xbf16>, vector<8x64xf32> -> vector<8x64xf32>
    %12 = vector.extract_strided_slice %11 {offsets = [0, 0], sizes = [8, 32], strides = [1, 1]} : vector<8x64xf32> to vector<8x32xf32>
    %13 = vector.extract_strided_slice %11 {offsets = [0, 32], sizes = [8, 32], strides = [1, 1]} : vector<8x64xf32> to vector<8x32xf32>
    %14 = arith.maximumf %12, %13 : vector<8x32xf32>
    %c0_6 = arith.constant 0 : index
    %c0_7 = arith.constant 0 : index
    %15 = vector.load %arg4[%c0_6, %c0_7] : memref<1x32xf32, #tpu.memory_space<vmem>>, vector<1x32xf32>
    %16 = vector.broadcast %15 : vector<1x32xf32> to vector<8x32xf32>
    %17 = arith.addf %14, %16 : vector<8x32xf32>
    %cst_8 = arith.constant 0.000000e+00 : f32
    %18 = vector.broadcast %cst_8 : f32 to vector<8x32xf32>
    %19 = arith.maximumf %17, %18 : vector<8x32xf32>
    %20 = arith.truncf %19 : vector<8x32xf32> to vector<8x32xbf16>
    %c0_9 = arith.constant 0 : index
    %c0_10 = arith.constant 0 : index
    %21 = vector.load %arg5[%c0_9, %c0_10] : memref<32x32xbf16, #tpu.memory_space<vmem>>, vector<32x32xbf16>
    %cst_11 = arith.constant dense<0.000000e+00> : vector<8x32xf32>
    %22 = tpu.matmul %20, %21, %cst_11 {dimension_numbers = #tpu.dot_dimension_numbers<[1], [0], [0], [1], [0, 0, 1, 1], [], []>} : vector<8x32xbf16>, vector<32x32xbf16>, vector<8x32xf32> -> vector<8x32xf32>
    %c0_12 = arith.constant 0 : index
    %c0_13 = arith.constant 0 : index
    %23 = vector.load %arg6[%c0_12, %c0_13] : memref<1x32xf32, #tpu.memory_space<vmem>>, vector<1x32xf32>
    %24 = vector.broadcast %23 : vector<1x32xf32> to vector<8x32xf32>
    %25 = arith.addf %22, %24 : vector<8x32xf32>
    %cst_14 = arith.constant 0.000000e+00 : f32
    %26 = vector.broadcast %cst_14 : f32 to vector<8x32xf32>
    %27 = arith.maximumf %25, %26 : vector<8x32xf32>
    %c0_15 = arith.constant 0 : index
    %c0_16 = arith.constant 0 : index
    %28 = vector.load %arg7[%c0_15, %c0_16] : memref<8x32xf32, #tpu.memory_space<vmem>>, vector<8x32xf32>
    tpu.vector_store %arg7[%c0_15, %c0_16], %27 {strides = array<i32>} : memref<8x32xf32, #tpu.memory_space<vmem>>, vector<8x32xf32>,
    return
  }
  func.func @transform_0(%arg0: i32) -> (i32, i32) {
    %c0_i32 = arith.constant 0 : i32
    %c0_i32_0 = arith.constant 0 : i32
    return %arg0, %c0_i32 : i32, i32
  }
  func.func @transform_1(%arg0: i32) -> (i32, i32) {
    %c0_i32 = arith.constant 0 : i32
    %c0_i32_0 = arith.constant 0 : i32
    %c0_i32_1 = arith.constant 0 : i32
    return %c0_i32, %c0_i32_0 : i32, i32
  }
  func.func @transform_2(%arg0: i32) -> (i32, i32) {
    %c0_i32 = arith.constant 0 : i32
    %c0_i32_0 = arith.constant 0 : i32
    %c0_i32_1 = arith.constant 0 : i32
    return %c0_i32, %c0_i32_0 : i32, i32
  }
  func.func @transform_3(%arg0: i32) -> (i32, i32) {
    %c0_i32 = arith.constant 0 : i32
    %c0_i32_0 = arith.constant 0 : i32
    %c0_i32_1 = arith.constant 0 : i32
    return %c0_i32, %c0_i32_0 : i32, i32
  }
  func.func @transform_4(%arg0: i32) -> (i32, i32) {
    %c0_i32 = arith.constant 0 : i32
    %c0_i32_0 = arith.constant 0 : i32
    %c0_i32_1 = arith.constant 0 : i32
    return %c0_i32, %c0_i32_0 : i32, i32
  }
  func.func @transform_5(%arg0: i32) -> (i32, i32) {
    %c0_i32 = arith.constant 0 : i32
    %c0_i32_0 = arith.constant 0 : i32
    %c0_i32_1 = arith.constant 0 : i32
    return %c0_i32, %c0_i32_0 : i32, i32
  }
  func.func @transform_6(%arg0: i32) -> (i32, i32) {
    %c0_i32 = arith.constant 0 : i32
    %c0_i32_0 = arith.constant 0 : i32
    return %arg0, %c0_i32 : i32, i32
  }
}

</mosaic_0001>

<bundles_post_ra>
// kernel: forward.1
= control target key start
LH: loop header
LB: loop body
LE: loop exit
PB: predicated region body
PF: predicated region fallthrough
CT: control target
= control target key end

     0   :  { %11 = vsyncpa [#allocation3], 0  ;;  %s568_s0 = inlined_call_operand.vmem [shape: bf16[8,64], index: 0, kind: input, shape index: {}]   ;;  %s569_s1 = inlined_call_operand.vmem [shape: bf16[64,66], index: 1, kind: input, shape index: {}]   ;;  %s570_s2 = inlined_call_operand.hbm [shape: bf16[33,64], index: 2, kind: input, shape index: {}]   ;;  %s571_s3 = inlined_call_operand.vmem [shape: f32[1,32], index: 3, kind: input, shape index: {}]   ;;  %s572_s4 = inlined_call_operand.hbm [shape: bf16[32,32], index: 4, kind: input, shape index: {}]   ;;  %s573_s5 = inlined_call_operand.vmem [shape: f32[1,32], index: 5, kind: input, shape index: {}]   ;;  %s574_s6 = inlined_call_operand.hbm [shape: f32[8,32], index: 6, kind: output, shape index: {}]  }
   0x1   :  { %12 = vsyncpa [#allocation6], 0 }
   0x2   :  { %13 = vsyncpa [#allocation4], 0  ;;  %s463_s21 = smov [#allocation2]   ;;  %s391_s25 = scalar_lea.hbm %s570_s2, 320 }
   0x3   :  { %s23_s22 = sshll.u32 %s463_s21, 4  ;;  %p392_p0 = scmp.ne.s32.totalorder %s570_s2, %s391_s25  ;;  %s24_s22 = int_to_ptr.vmem [resolvable:$true] %s23_s22 }
   0x4   :  { %p395_p1 = scmp.lt.u32.totalorder %s391_s25, %s570_s2 }
   0x6   :  { %p397_p2 = pnand %p395_p1, %p392_p0 }
   0x8   :  { %400 = shalt.err (!%p397_p2)
}
   0x9   :  { %s401_s30 = scalar_lea.vmem %s24_s22, 320  ;;  %p406_p4 = scmp.lt.s32.totalorder %s24_s22, %s24_s22 }
   0xa   :  { %p402_p3 = scmp.ne.s32.totalorder %s24_s22, %s401_s30  ;;  %p407_p5 = scmp.lt.s32.totalorder %s401_s30, %s401_s30 }
   0xc   :  { %p408_p6 = por %p407_p5, %p406_p4 }
   0xe   :  { %p409_p7 = pnand %p408_p6, %p402_p3 }
  0x10   :  { %412 = shalt.err (!%p409_p7)
}
  0x11   :  { %s464_s7 = smov 64   ;;  %s465_s8 = smov 4  }
  0x12   :  { %29 = dma.hbm_to_vmem [thread:$0]  %s570_s2, 320, %s24_s22, [#allocation3], %s464_s7, %s464_s7, %s465_s8  }
  0x13   :  { %s466_s11 = smov [#allocation5]   ;;  %s413_s15 = scalar_lea.hbm %s572_s4, 256 }
  0x14   :  { %s37_s12 = sshll.u32 %s466_s11, 4  ;;  %p414_p8 = scmp.ne.s32.totalorder %s572_s4, %s413_s15  ;;  %s38_s12 = int_to_ptr.vmem [resolvable:$true] %s37_s12 }
  0x15   :  { %p417_p9 = scmp.lt.u32.totalorder %s413_s15, %s572_s4 }
  0x17   :  { %p419_p10 = pnand %p417_p9, %p414_p8 }
  0x19   :  { %422 = shalt.err (!%p419_p10)
}
  0x1a   :  { %s423_s20 = scalar_lea.vmem %s38_s12, 256  ;;  %p428_p12 = scmp.lt.s32.totalorder %s38_s12, %s38_s12 }
  0x1b   :  { %p424_p11 = scmp.ne.s32.totalorder %s38_s12, %s423_s20  ;;  %p429_p13 = scmp.lt.s32.totalorder %s423_s20, %s423_s20 }
  0x1d   :  { %p430_p0 = por %p429_p13, %p428_p12 }
  0x1f   :  { %p431_p1 = pnand %p430_p0, %p424_p11 }
  0x21   :  { %434 = shalt.err (!%p431_p1)
}
  0x22   :  { %43 = dma.hbm_to_vmem [thread:$0]  %s572_s4, 256, %s38_s12, [#allocation6], %s464_s7, %s464_s7, %s465_s8  }
  0x23   :  { %457 = dma.done.wait [#allocation3], 320  }
  0x24   :  { %458 = vsyncadd [#allocation3], 4294966976 }
  0x25   :  { %459 = dma.done.wait [#allocation6], 256  }
  0x26   :  { %460 = vsyncadd [#allocation6], 4294967040  ;;  %v467_v0 = vmov 0.0   ;;  %vm468_vm0 = vmmov 0   ;;  %v380_v1 = vld [vmem:[%s569_s1] sm:$0xff]   ;;  %v381_v2 = vld [vmem:[%s569_s1 + $0x8] sm:$0xff]  }
  0x27   :  { %340 = vmatprep.subr.bf16.mxu0 %v467_v0  ;;  %348 = vmatprep.mubr.msk.bf16.mxu0 %vm468_vm0, %v467_v0  ;;  %v382_v3 = vld [vmem:[%s569_s1 + $0x10] sm:$0xff]   ;;  %v383_v4 = vld [vmem:[%s569_s1 + $0x18] sm:$0xff]   ;;  %v53_v5 = vld [vmem:[%s568_s0] sm:$0xf]  ;;  %vm86_vm1 = vcmask 523264   ;;  %vm168_vm2 = vcmask 1040384  }
  0x28   :  { %352 = vmatprep.subr.bf16.mxu1 %v467_v0  ;;  %358 = vmatprep.mubr.msk.bf16.mxu1 %vm468_vm0, %v467_v0  ;;  %v384_v6 = vld [vmem:[#allocation2] sm:$0xff]   ;;  %v385_v7 = vld [vmem:[#allocation2 + $0x8] sm:$0xff]   ;;  %v386_v8 = vld [vmem:[#allocation2 + $0x10] ss:$0 sps:$4 sm:$0x11]   ;;  %v469_v9 = vmov 0  }
  0x29   :  { %341 = vmatpush3.bf16.msra.mxu0 %v380_v1  ;;  %353 = vmatpush3.bf16.msra.mxu1 %v384_v6  ;;  %v170_v10 = vsel %vm168_vm2, 65535, %v469_v9  ;;  %s470_s1 = smov 95   ;;  %vm164_vm5 = vcmask 269312   ;;  %v387_v25 = vld [vmem:[#allocation5] sm:$0xff]   ;;  %v388_v26 = vld [vmem:[#allocation5 + $0x8] sm:$0xff]   ;;  %s471_s0 = smov 96  }
  0x2a   :  { %342 = vmatprep.subr.bf16.mxu0 %v467_v0  ;;  %354 = vmatprep.subr.bf16.mxu1 %v467_v0  ;;  %v172_v11 = vand.u32 %v386_v8, %v170_v10  ;;  %v323_v31 = vld [vmem:[%s571_s3] ss:$0 sm:$0xff]  ;;  %vm252_vm6 = vcmask 261120   ;;  %s472_s11 = smov [#allocation7]  }
  0x2b   :  { %v324_v37 = vld [vmem:[%s573_s5] ss:$0 sm:$0xff]  ;;  %s304_s12 = sshll.u32 %s472_s11, 4  ;;  %s305_s12 = int_to_ptr.vmem [resolvable:$true] %s304_s12 }
  0x2c   :  { %s435_s3 = scalar_lea.vmem %s305_s12, 128  ;;  %p440_p3 = scmp.lt.s32.totalorder %s305_s12, %s305_s12 }
  0x2d   :  { %343 = vmatpush3.bf16.msra.mxu0 %v381_v2  ;;  %355 = vmatpush3.bf16.msra.mxu1 %v385_v7  ;;  %p436_p2 = scmp.ne.s32.totalorder %s305_s12, %s435_s3  ;;  %p441_p4 = scmp.lt.s32.totalorder %s435_s3, %s435_s3 }
  0x2e   :  { %344 = vmatprep.subr.bf16.mxu0 %v467_v0  ;;  %356 = vmatprep.subr.bf16.mxu1 %v467_v0 }
  0x2f   :  { %p442_p5 = por %p441_p4, %p440_p3 }
  0x31   :  { %345 = vmatpush3.bf16.msra.mxu0 %v382_v3  ;;  %357 = vmatpush3.bf16.msra.mxu1 %v172_v11  ;;  %p443_p6 = pnand %p442_p5, %p436_p2 }
  0x32   :  { %346 = vmatprep.subr.bf16.mxu0 %v467_v0  ;;  %362 = vmatprep.subr.bf16.mxu1 %v467_v0 }
  0x35   :  { %347 = vmatpush3.bf16.msra.mxu0 %v383_v4 }
  0x38   :  { %349 = vmatmul.mubr.msk.bf16.vlgmr.msra.gmra.mrb[0].mxu0 %vm86_vm1, %v53_v5 }
 0x10b   :  { %v124_v12 = vpop.f32.mrb[0].mxu0 }
 0x10c   :  { %v130_v13 = vmul.f32 %v124_v12, %v124_v12  ;;  %v350_v14 = vpop.f32.mrb[1].mxu0 }
 0x10d   :  { %v127_v15 = vpop.f32.mrb[2].mxu0 }
 0x10e   :  { %132 = vrot.lane.b32.xlu0 %v130_v13, %s470_s1  ;;  %v351_v16 = vpop.f32.mrb[3].mxu0 }
 0x180   :  { %v133_v17 = vpop.permute.xlu0 %132 }
 0x181   :  { %v135_v18 = vadd.f32 %v133_v17, %v130_v13 }
 0x183   :  { %389 = vrsqrt.f32 %v135_v18  ;;  %vm138_vm3 = vcmp.eq.f32.partialorder %v135_v18, inf  ;;  %v141_v21 = vand.u32 2147483648, %v135_v18  ;;  %vm140_vm4 = vcmp.eq.f32.partialorder %v135_v18, 0.0 }
 0x18d   :  { %v390_v19 = vpop.eup %389 }
 0x18e   :  { %v137_v20 = vmul.f32 %v390_v19, %v135_v18 }
 0x190   :  { %v139_v22 = vsel %vm138_vm3, %v135_v18, %v137_v20 }
 0x191   :  { %v142_v23 = vsel %vm140_vm4, %v141_v21, %v139_v22 }
 0x192   :  { %v143_v24 = vpack.c.bf16 %v142_v23, %v142_v23 }
 0x194   :  { %359 = vmatmul.mubr.msk.bf16.vlgmr.msra.gmra.mrb[0].mxu1 %vm164_vm5, %v143_v24 }
 0x195   :  { %366 = vmatprep.mubr.msk.bf16.mxu1 %vm468_vm0, %v467_v0  ;;  %363 = vmatpush3.bf16.msra.mxu1 %v387_v25 }
 0x196   :  { %364 = vmatprep.subr.bf16.mxu1 %v467_v0 }
 0x199   :  { %365 = vmatpush3.bf16.msra.mxu1 %v388_v26 }
 0x267   :  { %v208_v27 = vpop.f32.mrb[0].mxu1 }
 0x268   :  { %215 = vrot.lane.b32.xlu0 %v208_v27, %s471_s0  ;;  %v360_v28 = vpop.f32.mrb[1].mxu1 }
 0x269   :  { %v211_v29 = vpop.f32.mrb[2].mxu1 }
 0x26a   :  { %v361_v30 = vpop.f32.mrb[3].mxu1 }
 0x2da   :  { %v216_v32 = vpop.permute.xlu0 %215 }
 0x2db   :  { %v218_v33 = vmax.f32 %v208_v27, %v216_v32 }
 0x2dd   :  { %v226_v34 = vadd.f32 %v323_v31, %v218_v33 }
 0x2df   :  { %v227_v35 = vmax.f32 %v226_v34, 0.0 }
 0x2e1   :  { %v228_v36 = vpack.c.bf16 %v227_v35, %v227_v35 }
 0x2e3   :  { %367 = vmatmul.mubr.msk.bf16.vlgmr.msra.gmra.mrb[4].mxu1 %vm252_vm6, %v228_v36 }
 0x3b6   :  { %v290_v38 = vpop.f32.mrb[4].mxu1 }
 0x3b7   :  { %v291_v39 = vadd.f32 %v324_v37, %v290_v38  ;;  %v368_v40 = vpop.f32.mrb[5].mxu1 }
 0x3b8   :  { %v293_v41 = vpop.f32.mrb[6].mxu1 }
 0x3b9   :  { %v296_v42 = vmax.f32 %v291_v39, 0.0  ;;  %v369_v43 = vpop.f32.mrb[7].mxu1 }
 0x3bb   :  { %297 = vst.msk [vmem:[#allocation7] sm:$0xff] %vm252_vm6, %v296_v42 }
 0x3bc   :  { %446 = shalt.err (!%p443_p6)
}
 0x3bd   :  { %s447_s5 = scalar_lea.hbm %s574_s6, 128 }
 0x3be   :  { %p448_p7 = scmp.ne.s32.totalorder %s574_s6, %s447_s5  ;;  %p451_p8 = scmp.lt.u32.totalorder %s447_s5, %s574_s6 }
 0x3c0   :  { %p453_p9 = pnand %p451_p8, %p448_p7 }
 0x3c2   :  { %456 = shalt.err (!%p453_p9)
}
 0x3c3   :  { %307 = dma.vmem_to_hbm [thread:$0]  %s305_s12, 128, %s574_s6, [#allocation4]  }
 0x3c4   :  { %461 = dma.done.wait [#allocation4], 128  }
 0x3c5   :  { %462 = vsyncadd [#allocation4], 4294967168 }
 0x3c6   :  { %311 = vsyncpa [#allocation3], 1 }
 0x3c7   :  { %312 = vsyncpa [#allocation6], 1 }
 0x3c8   :  { %313 = vsyncpa [#allocation4], 1 }

</bundles_post_ra>
